<compile_context>
chip_gen: v6e
topology: v6e:2x2x1
jax: 0.10.0
libtpu: 0.0.40
codegen_flags: <defaults>
</compile_context>

<pallas_src>
import jax
import jax.numpy as jnp
from jax.experimental import pallas as pl
from jax.experimental.pallas import tpu as pltpu

# ---- model dimensions (small, consistent with the module) ----
BATCH = 2
NUM_INPUTS = 32          # total input feature dim F
HIST_HIDDEN = 8          # hps['hist']['HIDDEN_SIZE']  (H)
HIDDEN = (32, 32, 32)    # hidden[0], hidden[1], hidden[2]
NUM_ACTIONS = 8
REG_DIM = NUM_INPUTS - HIST_HIDDEN        # features kept untouched (24)

STAGE1_OUT = HIDDEN[0] + HIST_HIDDEN      # fused (trunk1 | hist1) width = 40
HEADS1_OUT = 2 * HIDDEN[2]                # fused (policy1 | value1) width = 64
OUT_LANES = 128                           # lane-dense output width

# ---- packed-parameter slab layout (rows of a [SLAB_ROWS, 128] f32 array) ----
# Every band starts on a 16-sublane boundary; unused lanes/rows are zero.
ROW_W1 = 0                        # [32, 40]  fused stage-1 weight
ROW_B1 = 32                       # [ 1, 40]  fused stage-1 bias
ROW_WHIST = 48                    # [40, 40]  folded history->trunk weight (rows 32..39 live)
ROW_WT2 = 96                      # [40, 32]  trunk layer-2 weight (rows 32..39 zero)
ROW_BT2 = 144                     # [ 1, 32]  trunk layer-2 bias
ROW_WHEAD1 = 160                  # [32, 64]  fused heads layer-1 weight
ROW_BHEAD1 = 192                  # [ 1, 64]  fused heads layer-1 bias
ROW_WHEAD2 = 208                  # [64,128]  fused heads layer-2 + dueling fold
ROW_BHEAD2 = 272                  # [ 1,128]  fused heads layer-2 bias (+ dueling fold)
SLAB_ROWS = 280


def _round_up(n, m):
    return ((n + m - 1) // m) * m


def _dueling_kernel(x_ref, w_ref, o_ref):
    """x_ref: [bb, F]; w_ref: [SLAB_ROWS, 128] packed params; o_ref: [bb, 128]."""
    x = x_ref[...]                                                   # [bb, 32]

    # --- stage 1 (fused): z[:, :32] = x_reg @ Wt1_reg + bt1_eff
    #                      z[:, 32:40] = x_hist @ Wh1 + bh1
    w1 = w_ref[ROW_W1:ROW_W1 + NUM_INPUTS, :STAGE1_OUT]              # [32, 40]
    b1 = w_ref[ROW_B1:ROW_B1 + 1, :STAGE1_OUT]                       # [ 1, 40]
    z = jnp.dot(x, w1, preferred_element_type=jnp.float32) + b1      # [bb, 40]

    # --- history branch (wh2 folded): no lane slices -- zero-padded weight
    #     u[:, :32] = trunk-pre + ReLU(hist1-pre) @ w_hist_eff
    #     u[:, 32:] = hist1-pre (dead lanes, killed by zero rows in wt2_pad)
    wh = w_ref[ROW_WHIST:ROW_WHIST + STAGE1_OUT, :STAGE1_OUT]        # [40, 40]
    u = z + jnp.dot(jnp.maximum(z, 0.0), wh,
                    preferred_element_type=jnp.float32)              # [bb, 40]
    t = jnp.maximum(u, 0.0)                                          # [bb, 40]

    # --- trunk layer 2 (weight padded to K=40, rows 32..39 are zero) ---
    wt2 = w_ref[ROW_WT2:ROW_WT2 + STAGE1_OUT, :HIDDEN[1]]            # [40, 32]
    bt2 = w_ref[ROW_BT2:ROW_BT2 + 1, :HIDDEN[1]]                     # [ 1, 32]
    t = jnp.maximum(
        jnp.dot(t, wt2, preferred_element_type=jnp.float32) + bt2, 0.0)

    # --- fused heads, layer 1: [policy1 | value1] ---
    wh1h = w_ref[ROW_WHEAD1:ROW_WHEAD1 + HIDDEN[1], :HEADS1_OUT]     # [32, 64]
    bh1h = w_ref[ROW_BHEAD1:ROW_BHEAD1 + 1, :HEADS1_OUT]             # [ 1, 64]
    hv = jnp.maximum(
        jnp.dot(t, wh1h, preferred_element_type=jnp.float32) + bh1h, 0.0)

    # --- fused heads layer 2 with the dueling aggregation folded in ---
    # lanes 0..A-1 are q = v + a - mean(a); lanes A..127 are zero weight/bias.
    wh2h = w_ref[ROW_WHEAD2:ROW_WHEAD2 + HEADS1_OUT, :]              # [64, 128]
    bh2h = w_ref[ROW_BHEAD2:ROW_BHEAD2 + 1, :]                       # [ 1, 128]
    o_ref[...] = jnp.dot(hv, wh2h, preferred_element_type=jnp.float32) + bh2h


def dueling_forward(x, slab, *, block_b=2048):
    """x: [B, F] float32; slab: [SLAB_ROWS, 128] packed params. Returns [B, A]."""
    B, F = x.shape
    assert F == NUM_INPUTS

    Bp8 = _round_up(B, 8)
    bb = min(_round_up(block_b, 8), Bp8)           # batch tile (multiple of 8)
    if Bp8 >= 16:
        # ensure >= 2 grid steps so the "parallel" axis can split across the
        # two TensorCores on v7x; neutral on v5e/v6e.
        bb = min(bb, _round_up((Bp8 + 1) // 2, 8))
    Bp = _round_up(B, bb)
    if Bp != B:
        x = jnp.pad(x, ((0, Bp - B), (0, 0)))
    grid = (Bp // bb,)

    flops = 2 * Bp * (NUM_INPUTS * STAGE1_OUT
                      + STAGE1_OUT * STAGE1_OUT
                      + STAGE1_OUT * HIDDEN[1]
                      + HIDDEN[1] * HEADS1_OUT
                      + HEADS1_OUT * OUT_LANES)
    bytes_accessed = (Bp * NUM_INPUTS + SLAB_ROWS * 128 + Bp * OUT_LANES) * 4

    out = pl.pallas_call(
        _dueling_kernel,
        out_shape=jax.ShapeDtypeStruct((Bp, OUT_LANES), jnp.float32),
        grid=grid,
        in_specs=[
            pl.BlockSpec((bb, NUM_INPUTS), lambda i: (i, 0)),
            pl.BlockSpec((SLAB_ROWS, 128), lambda i: (0, 0)),  # resident weights
        ],
        out_specs=pl.BlockSpec((bb, OUT_LANES), lambda i: (i, 0)),
        compiler_params=pltpu.CompilerParams(
            dimension_semantics=("parallel",)),
        cost_estimate=pl.CostEstimate(flops=flops, transcendentals=0,
                                      bytes_accessed=bytes_accessed),
    )(x, slab)
    return out[:B, :NUM_ACTIONS]


def _init_linear(key, fan_in, fan_out):
    """PyTorch-style uniform(-1/sqrt(fan_in), 1/sqrt(fan_in)) init.

    Returns W as [in, out] (pre-transposed) and b as [1, out].
    """
    kw, kb = jax.random.split(key)
    bound = 1.0 / jnp.sqrt(jnp.float32(fan_in))
    w = jax.random.uniform(kw, (fan_in, fan_out), jnp.float32, -bound, bound)
    b = jax.random.uniform(kb, (1, fan_out), jnp.float32, -bound, bound)
    return w, b


def make_params(key):
    keys = jax.random.split(key, 8)
    # history preprocessing: H -> H -> H
    wh1, bh1 = _init_linear(keys[0], HIST_HIDDEN, HIST_HIDDEN)
    wh2, bh2 = _init_linear(keys[1], HIST_HIDDEN, HIST_HIDDEN)
    # trunk: F -> h0 -> h1
    wt1, bt1 = _init_linear(keys[2], NUM_INPUTS, HIDDEN[0])
    wt2, bt2 = _init_linear(keys[3], HIDDEN[0], HIDDEN[1])
    # policy head: h1 -> h2 -> A
    wp1, bp1 = _init_linear(keys[4], HIDDEN[1], HIDDEN[2])
    wp2, bp2 = _init_linear(keys[5], HIDDEN[2], NUM_ACTIONS)
    # value head: h1 -> h2 -> 1
    wv1, bv1 = _init_linear(keys[6], HIDDEN[1], HIDDEN[2])
    wv2, bv2 = _init_linear(keys[7], HIDDEN[2], 1)
    return (wh1, bh1, wh2, bh2,
            wt1, bt1, wt2, bt2,
            wp1, bp1, wp2, bp2,
            wv1, bv1, wv2, bv2)


def pack_params(params):
    """Fuse/fold layers and pack everything into one [SLAB_ROWS, 128] f32 slab."""
    (wh1, bh1, wh2, bh2,
     wt1, bt1, wt2, bt2,
     wp1, bp1, wp2, bp2,
     wv1, bv1, wv2, bv2) = params

    wt1_reg = wt1[:REG_DIM, :]                 # [24, 32]
    wt1_hist = wt1[REG_DIM:, :]                # [ 8, 32]

    # Fold second history Linear into the trunk's first layer (exact algebra).
    w_hist_eff = wh2 @ wt1_hist                # [8, 32]
    bt1_eff = bt1 + bh2 @ wt1_hist             # [1, 32]

    # Fused stage-1 block matrix: x(32) -> [trunk1-pre(32) | hist1-pre(8)].
    w1_big = jnp.zeros((NUM_INPUTS, STAGE1_OUT), jnp.float32)
    w1_big = w1_big.at[:REG_DIM, :HIDDEN[0]].set(wt1_reg)
    w1_big = w1_big.at[REG_DIM:, HIDDEN[0]:].set(wh1)
    b1_big = jnp.concatenate([bt1_eff, bh1], axis=1)           # [1, 40]

    # History-fold weight padded to [40, 40] so the kernel can use ReLU(z)
    # directly (no misaligned lane slice): only rows 32..39 / cols 0..31 live.
    w_hist_pad = jnp.zeros((STAGE1_OUT, STAGE1_OUT), jnp.float32)
    w_hist_pad = w_hist_pad.at[HIDDEN[0]:, :HIDDEN[0]].set(w_hist_eff)

    # Trunk layer-2 weight padded to K=40 (rows 32..39 zero kill dead lanes).
    wt2_pad = jnp.zeros((STAGE1_OUT, HIDDEN[1]), jnp.float32)
    wt2_pad = wt2_pad.at[:HIDDEN[0], :].set(wt2)

    # Fused heads layer 1: [policy1 | value1].
    w_heads1 = jnp.concatenate([wp1, wv1], axis=1)             # [32, 64]
    b_heads1 = jnp.concatenate([bp1, bv1], axis=1)             # [1, 64]

    # Fused heads layer 2 with the dueling aggregation folded in, padded to
    # 128 lanes so the last dot writes the lane-dense output tile directly:
    #   q = a @ (I - ones/A) + v @ ones(1, A)
    A = NUM_ACTIONS
    m_center = jnp.eye(A, dtype=jnp.float32) - jnp.ones((A, A), jnp.float32) / A
    ones_row = jnp.ones((1, A), jnp.float32)
    w_heads2 = jnp.zeros((HEADS1_OUT, OUT_LANES), jnp.float32)
    w_heads2 = w_heads2.at[:HIDDEN[2], :A].set(wp2 @ m_center)
    w_heads2 = w_heads2.at[HIDDEN[2]:, :A].set(wv2 @ ones_row)
    b_heads2 = jnp.zeros((1, OUT_LANES), jnp.float32)
    b_heads2 = b_heads2.at[:, :A].set(bp2 @ m_center + bv2 @ ones_row)

    slab = jnp.zeros((SLAB_ROWS, 128), jnp.float32)

    def put(s, row, arr):
        r, c = arr.shape
        return s.at[row:row + r, :c].set(arr)

    slab = put(slab, ROW_W1, w1_big)
    slab = put(slab, ROW_B1, b1_big)
    slab = put(slab, ROW_WHIST, w_hist_pad)
    slab = put(slab, ROW_WT2, wt2_pad)
    slab = put(slab, ROW_BT2, bt2)
    slab = put(slab, ROW_WHEAD1, w_heads1)
    slab = put(slab, ROW_BHEAD1, b_heads1)
    slab = put(slab, ROW_WHEAD2, w_heads2)
    slab = put(slab, ROW_BHEAD2, b_heads2)
    return slab


def dueling_forward_ref(x, params):
    """Pure-JAX reference mirroring the PyTorch forward exactly (incl. concat)."""
    (wh1, bh1, wh2, bh2,
     wt1, bt1, wt2, bt2,
     wp1, bp1, wp2, bp2,
     wv1, bv1, wv2, bv2) = params
    x_reg = x[:, :REG_DIM]
    x_hist = x[:, REG_DIM:]
    h = jnp.maximum(x_hist @ wh1 + bh1, 0.0) @ wh2 + bh2
    combined = jnp.concatenate([x_reg, h], axis=1)
    t = jnp.maximum(combined @ wt1 + bt1, 0.0)
    t = jnp.maximum(t @ wt2 + bt2, 0.0)
    a = jnp.maximum(t @ wp1 + bp1, 0.0) @ wp2 + bp2
    v = jnp.maximum(t @ wv1 + bv1, 0.0) @ wv2 + bv2
    return v + a - jnp.mean(a, axis=1, keepdims=True)


if __name__ == "__main__":
    key = jax.random.PRNGKey(0)
    k_params, k_x = jax.random.split(key)
    params = make_params(k_params)
    slab = pack_params(params)
    x = jax.random.normal(k_x, (BATCH, NUM_INPUTS), jnp.float32)

    q = dueling_forward(x, slab)
    q = jax.block_until_ready(q)

    q_ref = dueling_forward_ref(x, params)
    assert q.shape == (BATCH, NUM_ACTIONS)
    # fusion/folding only re-associates f32 sums -> tiny rounding differences
    assert jnp.allclose(q, q_ref, atol=1e-4, rtol=1e-4), "mismatch vs JAX reference"

    print("KERNEL_OK")
</pallas_src>

<mosaic_0001>
module attributes {stable_mosaic.version = 11 : i64} {
  func.func @_dueling_kernel(%arg0: i32, %arg1: memref<8x32xf32, #tpu.memory_space<vmem>>, %arg2: memref<280x128xf32, #tpu.memory_space<vmem>>, %arg3: memref<8x128xf32, #tpu.memory_space<vmem>>) attributes {dimension_semantics = [#tpu.dimension_semantics<parallel>], iteration_bounds = array<i64: 1>, scalar_prefetch = 0 : i64, scratch_operands = 0 : i64, tpu.core_type = #tpu.core_type<tc>, window_params = [{transform_indices = @transform_0, window_bounds = array<i64: 8, 32>}, {pipeline_mode = #tpu.pipeline_mode<synchronous>, transform_indices = @transform_1, window_bounds = array<i64: 280, 128>}, {transform_indices = @transform_2, window_bounds = array<i64: 8, 128>}]} {
    %c0 = arith.constant 0 : index
    %c0_0 = arith.constant 0 : index
    %0 = vector.load %arg1[%c0, %c0_0] : memref<8x32xf32, #tpu.memory_space<vmem>>, vector<8x32xf32>
    %c0_1 = arith.constant 0 : index
    %c0_2 = arith.constant 0 : index
    %1 = vector.load %arg2[%c0_1, %c0_2] : memref<280x128xf32, #tpu.memory_space<vmem>>, vector<32x40xf32>
    %c32 = arith.constant 32 : index
    %c0_3 = arith.constant 0 : index
    %2 = vector.load %arg2[%c32, %c0_3] : memref<280x128xf32, #tpu.memory_space<vmem>>, vector<1x40xf32>
    %cst = arith.constant dense<0.000000e+00> : vector<8x40xf32>
    %3 = tpu.matmul %0, %1, %cst {dimension_numbers = #tpu.dot_dimension_numbers<[1], [0], [0], [1], [0, 0, 1, 1], [], []>} : vector<8x32xf32>, vector<32x40xf32>, vector<8x40xf32> -> vector<8x40xf32>
    %4 = vector.broadcast %2 : vector<1x40xf32> to vector<8x40xf32>
    %5 = arith.addf %3, %4 : vector<8x40xf32>
    %c48 = arith.constant 48 : index
    %c0_4 = arith.constant 0 : index
    %6 = vector.load %arg2[%c48, %c0_4] : memref<280x128xf32, #tpu.memory_space<vmem>>, vector<40x40xf32>
    %cst_5 = arith.constant 0.000000e+00 : f32
    %7 = vector.broadcast %cst_5 : f32 to vector<8x40xf32>
    %8 = arith.maximumf %5, %7 : vector<8x40xf32>
    %cst_6 = arith.constant dense<0.000000e+00> : vector<8x40xf32>
    %9 = tpu.matmul %8, %6, %cst_6 {dimension_numbers = #tpu.dot_dimension_numbers<[1], [0], [0], [1], [0, 0, 1, 1], [], []>} : vector<8x40xf32>, vector<40x40xf32>, vector<8x40xf32> -> vector<8x40xf32>
    %10 = arith.addf %5, %9 : vector<8x40xf32>
    %cst_7 = arith.constant 0.000000e+00 : f32
    %11 = vector.broadcast %cst_7 : f32 to vector<8x40xf32>
    %12 = arith.maximumf %10, %11 : vector<8x40xf32>
    %c96 = arith.constant 96 : index
    %c0_8 = arith.constant 0 : index
    %13 = vector.load %arg2[%c96, %c0_8] : memref<280x128xf32, #tpu.memory_space<vmem>>, vector<40x32xf32>
    %c144 = arith.constant 144 : index
    %c0_9 = arith.constant 0 : index
    %14 = vector.load %arg2[%c144, %c0_9] : memref<280x128xf32, #tpu.memory_space<vmem>>, vector<1x32xf32>
    %cst_10 = arith.constant dense<0.000000e+00> : vector<8x32xf32>
    %15 = tpu.matmul %12, %13, %cst_10 {dimension_numbers = #tpu.dot_dimension_numbers<[1], [0], [0], [1], [0, 0, 1, 1], [], []>} : vector<8x40xf32>, vector<40x32xf32>, vector<8x32xf32> -> vector<8x32xf32>
    %16 = vector.broadcast %14 : vector<1x32xf32> to vector<8x32xf32>
    %17 = arith.addf %15, %16 : vector<8x32xf32>
    %cst_11 = arith.constant 0.000000e+00 : f32
    %18 = vector.broadcast %cst_11 : f32 to vector<8x32xf32>
    %19 = arith.maximumf %17, %18 : vector<8x32xf32>
    %c160 = arith.constant 160 : index
    %c0_12 = arith.constant 0 : index
    %20 = vector.load %arg2[%c160, %c0_12] : memref<280x128xf32, #tpu.memory_space<vmem>>, vector<32x64xf32>
    %c192 = arith.constant 192 : index
    %c0_13 = arith.constant 0 : index
    %21 = vector.load %arg2[%c192, %c0_13] : memref<280x128xf32, #tpu.memory_space<vmem>>, vector<1x64xf32>
    %cst_14 = arith.constant dense<0.000000e+00> : vector<8x64xf32>
    %22 = tpu.matmul %19, %20, %cst_14 {dimension_numbers = #tpu.dot_dimension_numbers<[1], [0], [0], [1], [0, 0, 1, 1], [], []>} : vector<8x32xf32>, vector<32x64xf32>, vector<8x64xf32> -> vector<8x64xf32>
    %23 = vector.broadcast %21 : vector<1x64xf32> to vector<8x64xf32>
    %24 = arith.addf %22, %23 : vector<8x64xf32>
    %cst_15 = arith.constant 0.000000e+00 : f32
    %25 = vector.broadcast %cst_15 : f32 to vector<8x64xf32>
    %26 = arith.maximumf %24, %25 : vector<8x64xf32>
    %c208 = arith.constant 208 : index
    %c0_16 = arith.constant 0 : index
    %27 = vector.load %arg2[%c208, %c0_16] : memref<280x128xf32, #tpu.memory_space<vmem>>, vector<64x128xf32>
    %c272 = arith.constant 272 : index
    %c0_17 = arith.constant 0 : index
    %28 = vector.load %arg2[%c272, %c0_17] : memref<280x128xf32, #tpu.memory_space<vmem>>, vector<1x128xf32>
    %cst_18 = arith.constant dense<0.000000e+00> : vector<8x128xf32>
    %29 = tpu.matmul %26, %27, %cst_18 {dimension_numbers = #tpu.dot_dimension_numbers<[1], [0], [0], [1], [0, 0, 1, 1], [], []>} : vector<8x64xf32>, vector<64x128xf32>, vector<8x128xf32> -> vector<8x128xf32>
    %30 = vector.broadcast %28 : vector<1x128xf32> to vector<8x128xf32>
    %31 = arith.addf %29, %30 : vector<8x128xf32>
    %c0_19 = arith.constant 0 : index
    %c0_20 = arith.constant 0 : index
    %32 = vector.load %arg3[%c0_19, %c0_20] : memref<8x128xf32, #tpu.memory_space<vmem>>, vector<8x128xf32>
    tpu.vector_store %arg3[%c0_19, %c0_20], %31 {strides = array<i32>} : memref<8x128xf32, #tpu.memory_space<vmem>>, vector<8x128xf32>,
    return
  }
  func.func @transform_0(%arg0: i32) -> (i32, i32) {
    %c0_i32 = arith.constant 0 : i32
    %c0_i32_0 = arith.constant 0 : i32
    return %arg0, %c0_i32 : i32, i32
  }
  func.func @transform_1(%arg0: i32) -> (i32, i32) {
    %c0_i32 = arith.constant 0 : i32
    %c0_i32_0 = arith.constant 0 : i32
    %c0_i32_1 = arith.constant 0 : i32
    return %c0_i32, %c0_i32_0 : i32, i32
  }
  func.func @transform_2(%arg0: i32) -> (i32, i32) {
    %c0_i32 = arith.constant 0 : i32
    %c0_i32_0 = arith.constant 0 : i32
    return %arg0, %c0_i32 : i32, i32
  }
}

</mosaic_0001>

<bundles_post_ra>
// kernel: tpu_custom_call.1
= control target key start
LH: loop header
LB: loop body
LE: loop exit
PB: predicated region body
PF: predicated region fallthrough
CT: control target
= control target key end

     0   :  { %7 = vsyncpa [#allocation3], 0  ;;  %s726_s0 = inlined_call_operand.hbm [shape: f32[8,32], index: 0, kind: input, shape index: {}]   ;;  %s727_s1 = inlined_call_operand.hbm [shape: f32[280,128], index: 1, kind: input, shape index: {}]   ;;  %s728_s2 = inlined_call_operand.hbm [shape: f32[8,128], index: 2, kind: output, shape index: {}]  }
   0x1   :  { %8 = vsyncpa [#allocation6], 0 }
   0x2   :  { %9 = vsyncpa [#allocation4], 0  ;;  %s655_s9 = smov [#allocation2]   ;;  %s656_s11 = smov [#allocation5]  }
   0x3   :  { %s16_s10 = sshll.u32 %s655_s9, 4  ;;  %s25_s12 = sshll.u32 %s656_s11, 4  ;;  %s17_s10 = int_to_ptr.vmem [resolvable:$true] %s16_s10  ;;  %s26_s12 = int_to_ptr.vmem [resolvable:$true] %s25_s12 }
   0x4   :  { %s597_s13 = scalar_lea.vmem %s17_s10, 128  ;;  %p602_p1 = scmp.lt.s32.totalorder %s17_s10, %s17_s10 }
   0x5   :  { %p598_p0 = scmp.ne.s32.totalorder %s17_s10, %s597_s13  ;;  %p603_p2 = scmp.lt.s32.totalorder %s597_s13, %s597_s13 }
   0x7   :  { %p604_p3 = por %p603_p2, %p602_p1 }
   0x9   :  { %p605_p4 = pnand %p604_p3, %p598_p0 }
   0xb   :  { %608 = shalt.err (!%p605_p4)
}
   0xc   :  { %19 = dma.hbm_to_vmem [thread:$0]  %s726_s0, 128, %s17_s10, [#allocation3]  }
   0xd   :  { %s617_s16 = scalar_lea.vmem %s26_s12, 4480  ;;  %p622_p6 = scmp.lt.s32.totalorder %s26_s12, %s26_s12 }
   0xe   :  { %p618_p5 = scmp.ne.s32.totalorder %s26_s12, %s617_s16  ;;  %p623_p7 = scmp.lt.s32.totalorder %s617_s16, %s617_s16 }
  0x10   :  { %p624_p8 = por %p623_p7, %p622_p6 }
  0x12   :  { %p625_p9 = pnand %p624_p8, %p618_p5 }
  0x14   :  { %628 = shalt.err (!%p625_p9)
}
  0x15   :  { %s657_s17 = smov 128   ;;  %s658_s18 = smov 8  }
  0x16   :  { %31 = dma.hbm_to_vmem [thread:$0]  %s727_s1, 4480, %s26_s12, [#allocation6], %s657_s17, %s657_s17, %s658_s18  }
  0x17   :  { %649 = dma.done.wait [#allocation3], 128  }
  0x18   :  { %650 = vsyncadd [#allocation3], 4294967168 }
  0x19   :  { %651 = dma.done.wait [#allocation6], 4480  }
  0x1a   :  { %652 = vsyncadd [#allocation6], 4294962816  ;;  %v659_v0 = vmov 0.0   ;;  %vm660_vm0 = vmmov 0   ;;  %v42_v1 = vld [vmem:[#allocation5 + $0x18] sm:$0xff]  ;;  %v41_v2 = vld [vmem:[#allocation5 + $0x10] sm:$0xff] }
  0x1b   :  { %515 = vmatprep.subr.mxu1 %v659_v0  ;;  %523 = vmatprep.mubr.msk.f32.mxu1 %vm660_vm0, %v659_v0  ;;  %v40_v3 = vld [vmem:[#allocation5 + $0x8] sm:$0xff]  ;;  %v39_v4 = vld [vmem:[#allocation5] sm:$0xff]  ;;  %v38_v5 = vld [vmem:[#allocation2] sm:$0xff]  ;;  %vm48_vm1 = vcmask 261120   ;;  %vm128_vm2 = vcmask 326656   ;;  %vm384_vm3 = vcmask 523264  }
  0x1c   :  { %539 = vmatprep.subr.mxu0 %v659_v0  ;;  %549 = vmatprep.mubr.msk.f32.mxu0 %vm660_vm0, %v659_v0  ;;  %v126_v6 = vld [vmem:[#allocation5 + $0x50] sm:$0xff]  ;;  %v125_v7 = vld [vmem:[#allocation5 + $0x48] sm:$0xff]  ;;  %v124_v8 = vld [vmem:[#allocation5 + $0x40] sm:$0xff]  ;;  %s661_s0 = smov [#allocation7]  }
  0x1d   :  { %516 = vmatpush3.msra.mxu1 %v42_v1  ;;  %v123_v9 = vld [vmem:[#allocation5 + $0x38] sm:$0xff]  ;;  %v122_v10 = vld [vmem:[#allocation5 + $0x30] sm:$0xff]  ;;  %v208_v11 = vld [vmem:[#allocation5 + $0x80] sm:$0xff]  ;;  %s465_s1 = sshll.u32 %s661_s0, 4  ;;  %s466_s1 = int_to_ptr.vmem [resolvable:$true] %s465_s1 }
  0x1e   :  { %517 = vmatprep.subr.mxu1 %v659_v0  ;;  %v207_v12 = vld [vmem:[#allocation5 + $0x78] sm:$0xff]  ;;  %540 = vmatpush3.msra.mxu0 %v208_v11  ;;  %v475_v13 = vld [vmem:[#allocation5 + $0x20] ss:$0 sm:$0xff]  ;;  %v206_v18 = vld [vmem:[#allocation5 + $0x70] sm:$0xff]  ;;  %s629_s21 = scalar_lea.vmem %s466_s1, 128  ;;  %p634_p11 = scmp.lt.s32.totalorder %s466_s1, %s466_s1 }
  0x1f   :  { %518 = vmatpush3.msra.mxu1 %v41_v2  ;;  %541 = vmatprep.subr.mxu0 %v659_v0  ;;  %v205_v19 = vld [vmem:[#allocation5 + $0x68] sm:$0xff]  ;;  %v204_v20 = vld [vmem:[#allocation5 + $0x60] sm:$0xff]  ;;  %v291_v21 = vld [vmem:[#allocation5 + $0xb8] sm:$0xff]  ;;  %p630_p10 = scmp.ne.s32.totalorder %s466_s1, %s629_s21  ;;  %p635_p12 = scmp.lt.s32.totalorder %s629_s21, %s629_s21 }
  0x20   :  { %519 = vmatprep.subr.mxu1 %v659_v0  ;;  %542 = vmatpush3.msra.mxu0 %v207_v12  ;;  %v290_v26 = vld [vmem:[#allocation5 + $0xb0] sm:$0xff]  ;;  %v289_v27 = vld [vmem:[#allocation5 + $0xa8] sm:$0xff]  ;;  %v288_v28 = vld [vmem:[#allocation5 + $0xa0] sm:$0xff] }
  0x21   :  { %520 = vmatpush3.msra.mxu1 %v40_v3  ;;  %543 = vmatprep.subr.mxu0 %v659_v0  ;;  %v378_v29 = vld [vmem:[#allocation5 + $0x108] sm:$0xff]  ;;  %v377_v30 = vld [vmem:[#allocation5 + $0x100] sm:$0xff]  ;;  %v376_v31 = vld [vmem:[#allocation5 + $0xf8] sm:$0xff]  ;;  %p636_p13 = por %p635_p12, %p634_p11 }
  0x22   :  { %521 = vmatprep.subr.mxu1 %v659_v0  ;;  %544 = vmatpush3.msra.mxu0 %v206_v18  ;;  %v375_v32 = vld [vmem:[#allocation5 + $0xf0] sm:$0xff]  ;;  %v374_v33 = vld [vmem:[#allocation5 + $0xe8] sm:$0xff]  ;;  %v373_v39 = vld [vmem:[#allocation5 + $0xe0] sm:$0xff] }
  0x23   :  { %522 = vmatpush3.msra.mxu1 %v39_v4  ;;  %545 = vmatprep.subr.mxu0 %v659_v0  ;;  %v478_v34 = vld [vmem:[#allocation5 + $0x90] ss:$0 sm:$0xff]  ;;  %v372_v40 = vld [vmem:[#allocation5 + $0xd8] sm:$0xff]  ;;  %v480_v42 = vld [vmem:[#allocation5 + $0xc0] ss:$0 sm:$0xff]  ;;  %p637_p0 = pnand %p636_p13, %p630_p10 }
  0x24   :  { %524 = vmatmul.mubr.msk.f32.vlgmr.msra.gmra.mxu1 %vm48_vm1, %v38_v5  ;;  %526 = vmatprep.subr.mxu1 %v659_v0  ;;  %v371_v41 = vld [vmem:[#allocation5 + $0xd0] sm:$0xff] }
  0x25   :  { %527 = vmatpush3.msra.mxu1 %v126_v6  ;;  %536 = vmatprep.mubr.msk.f32.mxu1 %vm660_vm0, %v659_v0  ;;  %v482_v47 = vld [vmem:[#allocation5 + $0x110] ss:$0 sm:$0xff] }
  0x26   :  { %528 = vmatprep.subr.mxu1 %v659_v0  ;;  %546 = vmatpush3.msra.mxu0 %v205_v19 }
  0x27   :  { %529 = vmatpush3.msra.mxu1 %v125_v7  ;;  %547 = vmatprep.subr.mxu0 %v659_v0 }
  0x28   :  { %530 = vmatprep.subr.mxu1 %v659_v0  ;;  %548 = vmatpush3.msra.mxu0 %v204_v20 }
  0x29   :  { %531 = vmatpush3.msra.mxu1 %v124_v8  ;;  %563 = vmatprep.subr.mxu0 %v659_v0 }
  0x2a   :  { %532 = vmatprep.subr.mxu1 %v659_v0 }
  0x2b   :  { %533 = vmatpush3.msra.mxu1 %v123_v9 }
  0x2c   :  { %534 = vmatprep.subr.mxu1 %v659_v0 }
  0x2d   :  { %535 = vmatpush3.msra.mxu1 %v122_v10 }
  0x2e   :  { %552 = vmatprep.subr.mxu1 %v659_v0 }
  0xe4   :  { %v118_v14 = vpop.f32.mrf.mxu1 }
  0xe5   :  { %v119_v15 = vadd.f32 %v475_v13, %v118_v14 }
  0xe6   :  { %v525_v16 = vpop.f32.mrf.mxu1 }
  0xe7   :  { %v127_v17 = vmax.f32 %v119_v15, 0.0 }
  0xe9   :  { %537 = vmatmul.mubr.msk.f32.vlgmr.msra.gmra.mxu1 %vm128_vm2, %v127_v17 }
  0xea   :  { %560 = vmatprep.mubr.msk.f32.mxu1 %vm660_vm0, %v659_v0  ;;  %553 = vmatpush3.msra.mxu1 %v291_v21 }
  0xeb   :  { %554 = vmatprep.subr.mxu1 %v659_v0 }
  0xec   :  { %555 = vmatpush3.msra.mxu1 %v290_v26 }
  0xed   :  { %556 = vmatprep.subr.mxu1 %v659_v0 }
  0xee   :  { %557 = vmatpush3.msra.mxu1 %v289_v27 }
  0xef   :  { %558 = vmatprep.subr.mxu1 %v659_v0 }
  0xf0   :  { %559 = vmatpush3.msra.mxu1 %v288_v28 }
 0x1a9   :  { %v198_v22 = vpop.f32.mrf.mxu1 }
 0x1aa   :  { %v202_v23 = vadd.f32 %v198_v22, %v119_v15 }
 0x1ab   :  { %v538_v24 = vpop.f32.mrf.mxu1 }
 0x1ac   :  { %v203_v25 = vmax.f32 %v202_v23, 0.0 }
 0x1ae   :  { %550 = vmatmul.mubr.msk.f32.vlgmr.msra.gmra.mxu0 %vm128_vm2, %v203_v25 }
 0x1af   :  { %579 = vmatprep.mubr.msk.f32.mxu0 %vm660_vm0, %v659_v0  ;;  %564 = vmatpush3.msra.mxu0 %v378_v29 }
 0x1b0   :  { %565 = vmatprep.subr.mxu0 %v659_v0 }
 0x1b1   :  { %566 = vmatpush3.msra.mxu0 %v377_v30 }
 0x1b2   :  { %567 = vmatprep.subr.mxu0 %v659_v0 }
 0x1b3   :  { %568 = vmatpush3.msra.mxu0 %v376_v31 }
 0x1b4   :  { %569 = vmatprep.subr.mxu0 %v659_v0 }
 0x1b5   :  { %570 = vmatpush3.msra.mxu0 %v375_v32 }
 0x1b6   :  { %571 = vmatprep.subr.mxu0 %v659_v0 }
 0x1b7   :  { %572 = vmatpush3.msra.mxu0 %v374_v33 }
 0x1b8   :  { %573 = vmatprep.subr.mxu0 %v659_v0 }
 0x1b9   :  { %574 = vmatpush3.msra.mxu0 %v373_v39 }
 0x1ba   :  { %575 = vmatprep.subr.mxu0 %v659_v0 }
 0x1bb   :  { %576 = vmatpush3.msra.mxu0 %v372_v40 }
 0x1bc   :  { %577 = vmatprep.subr.mxu0 %v659_v0 }
 0x1bd   :  { %578 = vmatpush3.msra.mxu0 %v371_v41 }
 0x26e   :  { %v283_v35 = vpop.f32.mrf.mxu0 }
 0x26f   :  { %v284_v36 = vadd.f32 %v478_v34, %v283_v35 }
 0x270   :  { %v551_v37 = vpop.f32.mrf.mxu0 }
 0x271   :  { %v287_v38 = vmax.f32 %v284_v36, 0.0 }
 0x273   :  { %561 = vmatmul.mubr.msk.f32.vlgmr.msra.gmra.mxu1 %vm48_vm1, %v287_v38 }
 0x333   :  { %v366_v43 = vpop.f32.mrf.mxu1 }
 0x334   :  { %v367_v44 = vadd.f32 %v480_v42, %v366_v43 }
 0x335   :  { %v562_v45 = vpop.f32.mrf.mxu1 }
 0x336   :  { %v370_v46 = vmax.f32 %v367_v44, 0.0 }
 0x338   :  { %580 = vmatmul.mubr.msk.f32.vlgmr.msra.gmra.mxu0 %vm384_vm3, %v370_v46 }
 0x3f8   :  { %v454_v48 = vpop.f32.mrf.mxu0 }
 0x3f9   :  { %v455_v49 = vadd.f32 %v482_v47, %v454_v48 }
 0x3fa   :  { %v581_v50 = vpop.f32.mrf.mxu0 }
 0x3fb   :  { %458 = vst [vmem:[#allocation7] sm:$0xff] %v455_v49 }
 0x3fc   :  { %640 = shalt.err (!%p637_p0)
}
 0x3fd   :  { %468 = dma.vmem_to_hbm [thread:$0]  %s466_s1, 128, %s728_s2, [#allocation4]  }
 0x3fe   :  { %653 = dma.done.wait [#allocation4], 128  }
 0x3ff   :  { %654 = vsyncadd [#allocation4], 4294967168 }
 0x400   :  { %472 = vsyncpa [#allocation3], 1 }
 0x401   :  { %473 = vsyncpa [#allocation6], 1 }
 0x402   :  { %474 = vsyncpa [#allocation4], 1 }

</bundles_post_ra>
